<compile_context>
chip_gen: v5e
topology: v5e:2x2
jax: 0.10.0
libtpu: 0.0.40
codegen_flags: <defaults>
</compile_context>

<pallas_src>
import functools

import jax
import jax.numpy as jnp
from jax.experimental import pallas as pl
from jax.experimental.pallas import tpu as pltpu


def _round_up(x, m):
    return ((x + m - 1) // m) * m


def _rowsum(rows):
    s = rows[0]
    for r in rows[1:]:
        s = s + r
    return s


def _wasserstein_kernel(pred_ref, tgt_ref, loss_ref, *, eps):
    # pred_ref: (18, TN)  tgt_ref: (8, TN)  loss_ref: (1, TN)
    # All per-point reductions are unrolled sublane-row sums (pure VPU work,
    # no XLU cross-lane reductions).
    f32 = jnp.float32

    # Deinterleave x / y rows directly from the ref (cheap offset row loads).
    px = [pred_ref[2 * k : 2 * k + 1, :].astype(f32) for k in range(9)]  # 9 x (1, TN)
    py = [pred_ref[2 * k + 1 : 2 * k + 2, :].astype(f32) for k in range(9)]
    tx = [tgt_ref[2 * k : 2 * k + 1, :].astype(f32) for k in range(4)]   # 4 x (1, TN)
    ty = [tgt_ref[2 * k + 1 : 2 * k + 2, :].astype(f32) for k in range(4)]

    # ---- GMM(n_components=1).fit(pred): sample mean + biased covariance ----
    # TODO(synk): some GMM impls add a tiny diagonal regularizer during EM;
    # with a single component EM reduces exactly to mean / biased covariance.
    ninth = f32(1.0 / 9.0)
    mu_x = _rowsum(px) * ninth
    mu_y = _rowsum(py) * ninth
    dx = [p - mu_x for p in px]
    dy = [p - mu_y for p in py]
    p_xx = _rowsum([d * d for d in dx]) * ninth
    p_xy = _rowsum([a * b for a, b in zip(dx, dy)]) * ninth
    p_yy = _rowsum([d * d for d in dy]) * ninth

    # ---- gt2gaussian(target): polygon -> (center, R diag(w,h)/(4L^2) R^T), L=3 ----
    quarter = f32(0.25)
    cx = _rowsum(tx) * quarter
    cy = _rowsum(ty) * quarter
    e1x = tx[1] - tx[0]
    e1y = ty[1] - ty[0]
    e2x = tx[2] - tx[1]
    e2y = ty[2] - ty[1]
    w = e1x * e1x + e1y * e1y
    h = e2x * e2x + e2y * e2y
    # cos^2 = e1x^2/w, sin^2 = e1y^2/w, cos*sin = e1x*e1y/w  (no sqrt / divides).
    inv_w = pl.reciprocal(jnp.maximum(w, f32(1e-12)), approx=True)
    scale = f32(1.0 / 36.0)  # 1 / (4 * L * L), L = 3
    t_xx = (e1x * e1x + h * e1y * e1y * inv_w) * scale
    t_xy = (e1x * e1y * (f32(1.0) - h * inv_w)) * scale
    t_yy = (e1y * e1y + h * e1x * e1x * inv_w) * scale

    # ---- wtd_single2single: 2nd-order Wasserstein distance of 2x2 Gaussians ----
    dmx = mu_x - cx
    dmy = mu_y - cy
    term1 = dmx * dmx + dmy * dmy                                   # |mu_p - mu_t|^2

    tr_sum = p_xx + p_yy + t_xx + t_yy                              # trace(P + T)
    tr_pt = p_xx * t_xx + 2.0 * p_xy * t_xy + p_yy * t_yy           # trace(P @ T)
    det_pt = (p_xx * p_yy - p_xy * p_xy) * (t_xx * t_yy - t_xy * t_xy)  # det(P @ T)
    det_pt = jnp.maximum(det_pt, f32(0.0))                          # guard rounding
    inner = jnp.maximum(tr_pt + 2.0 * jnp.sqrt(det_pt), f32(0.0))
    term2 = tr_sum - 2.0 * jnp.sqrt(inner)

    wtd = jnp.maximum(term1 + term2, f32(eps))                      # clamp(min=eps)
    x = jnp.log1p(wtd)
    # 1 - 1/(1+x) == x/(1+x); approx reciprocal goes to the EUP slot.
    loss = x * pl.reciprocal(f32(1.0) + x, approx=True)

    loss_ref[...] = loss                                            # (1, TN) lane-dense


def wasserstein_loss_pallas(pred, target, *, eps=1e-6, reduction="mean",
                            loss_weight=1.0, tile_n=4096):
    """pred: reshapeable to (-1, 9, 2); target: reshapeable to (-1, 4, 2)."""
    pred = jnp.asarray(pred, jnp.float32).reshape(-1, 18)
    target = jnp.asarray(target, jnp.float32).reshape(-1, 8)
    n = pred.shape[0]
    assert target.shape[0] == n and target.size > 0

    # Lane-dense layout: N on the last (lane) axis; x/y deinterleaved in-kernel,
    # so no strided slices materialize extra HBM copies in the wrapper.
    pred_t = pred.T     # (18, N)
    tgt_t = target.T    # (8, N)

    tn = min(int(tile_n), _round_up(n, 128))
    n_pad = _round_up(n, tn)
    if n_pad != n:
        pred_t = jnp.pad(pred_t, ((0, 0), (0, n_pad - n)))
        tgt_t = jnp.pad(tgt_t, ((0, 0), (0, n_pad - n)))

    kernel = functools.partial(_wasserstein_kernel, eps=eps)
    loss_rows = pl.pallas_call(
        kernel,
        grid=(n_pad // tn,),
        in_specs=[
            pl.BlockSpec((18, tn), lambda i: (0, i)),
            pl.BlockSpec((8, tn), lambda i: (0, i)),
        ],
        out_specs=pl.BlockSpec((1, tn), lambda i: (0, i)),
        out_shape=jax.ShapeDtypeStruct((1, n_pad), jnp.float32),
        compiler_params=pltpu.CompilerParams(
            dimension_semantics=("parallel",)),
    )(pred_t, tgt_t)

    loss_per = loss_rows[0, :n]                 # (N,)
    if reduction == "mean":
        out = jnp.mean(loss_per)
    elif reduction == "sum":
        out = jnp.sum(loss_per)
    else:  # 'none'
        out = loss_per
    return loss_weight * out


class WassersteinLoss:
    """JAX/Pallas equivalent of the PyTorch WassersteinLoss module (weight=None path)."""

    def __init__(self, eps=1e-6, reduction="mean", loss_weight=1.0):
        self.eps = eps
        self.reduction = reduction
        self.loss_weight = loss_weight

    def __call__(self, pred, target, weight=None, avg_factor=None,
                 reduction_override=None):
        # TODO(synk): per-element `weight` / `avg_factor` handling of the
        # mmdet @weighted_loss wrapper is not implemented (weight=None path only).
        assert weight is None
        assert reduction_override in (None, "none", "mean", "sum")
        reduction = reduction_override if reduction_override else self.reduction
        return wasserstein_loss_pallas(
            pred, target, eps=self.eps, reduction=reduction,
            loss_weight=self.loss_weight)


if __name__ == "__main__":
    key = jax.random.PRNGKey(0)
    k_ctr, k_wh, k_pts = jax.random.split(key, 3)

    N = 8
    # Ground-truth boxes as 4-corner polygons (N, 4, 2) -> flattened (N, 8).
    ctr = jax.random.uniform(k_ctr, (N, 1, 2), minval=4.0, maxval=12.0)
    wh = jax.random.uniform(k_wh, (N, 1, 2), minval=2.0, maxval=6.0)
    corners = jnp.array([[-0.5, -0.5], [0.5, -0.5], [0.5, 0.5], [-0.5, 0.5]],
                        jnp.float32)
    target = (ctr + wh * corners[None]).reshape(N, 8)

    # Predicted point sets: 9 points per sample (N, 9, 2) -> flattened (N, 18).
    pred = (ctr + 1.5 * jax.random.normal(k_pts, (N, 9, 2))).reshape(N, 18)

    loss_mod = WassersteinLoss(eps=1e-6, reduction="mean", loss_weight=1.0)
    loss = loss_mod(pred, target)
    loss = jax.block_until_ready(loss)
    assert loss.shape == () and bool(jnp.isfinite(loss))

    # Also exercise the per-sample ('none') path once.
    loss_none = jax.block_until_ready(
        loss_mod(pred, target, reduction_override="none"))
    assert loss_none.shape == (N,) and bool(jnp.all(jnp.isfinite(loss_none)))

    print("KERNEL_OK")
</pallas_src>

<mosaic_0001>
module attributes {stable_mosaic.version = 11 : i64} {
  func.func @_wasserstein_kernel(%arg0: i32, %arg1: memref<18x128xf32, #tpu.memory_space<vmem>>, %arg2: memref<8x128xf32, #tpu.memory_space<vmem>>, %arg3: memref<1x128xf32, #tpu.memory_space<vmem>>) attributes {dimension_semantics = [#tpu.dimension_semantics<parallel>], iteration_bounds = array<i64: 1>, scalar_prefetch = 0 : i64, scratch_operands = 0 : i64, tpu.core_type = #tpu.core_type<tc>, window_params = [{transform_indices = @transform_0, window_bounds = array<i64: 18, 128>}, {transform_indices = @transform_1, window_bounds = array<i64: 8, 128>}, {transform_indices = @transform_2, window_bounds = array<i64: 1, 128>}]} {
    %c0 = arith.constant 0 : index
    %c0_0 = arith.constant 0 : index
    %0 = vector.load %arg1[%c0, %c0_0] : memref<18x128xf32, #tpu.memory_space<vmem>>, vector<1x128xf32>
    %c2 = arith.constant 2 : index
    %c0_1 = arith.constant 0 : index
    %1 = vector.load %arg1[%c2, %c0_1] : memref<18x128xf32, #tpu.memory_space<vmem>>, vector<1x128xf32>
    %c4 = arith.constant 4 : index
    %c0_2 = arith.constant 0 : index
    %2 = vector.load %arg1[%c4, %c0_2] : memref<18x128xf32, #tpu.memory_space<vmem>>, vector<1x128xf32>
    %c6 = arith.constant 6 : index
    %c0_3 = arith.constant 0 : index
    %3 = vector.load %arg1[%c6, %c0_3] : memref<18x128xf32, #tpu.memory_space<vmem>>, vector<1x128xf32>
    %c8 = arith.constant 8 : index
    %c0_4 = arith.constant 0 : index
    %4 = vector.load %arg1[%c8, %c0_4] : memref<18x128xf32, #tpu.memory_space<vmem>>, vector<1x128xf32>
    %c10 = arith.constant 10 : index
    %c0_5 = arith.constant 0 : index
    %5 = vector.load %arg1[%c10, %c0_5] : memref<18x128xf32, #tpu.memory_space<vmem>>, vector<1x128xf32>
    %c12 = arith.constant 12 : index
    %c0_6 = arith.constant 0 : index
    %6 = vector.load %arg1[%c12, %c0_6] : memref<18x128xf32, #tpu.memory_space<vmem>>, vector<1x128xf32>
    %c14 = arith.constant 14 : index
    %c0_7 = arith.constant 0 : index
    %7 = vector.load %arg1[%c14, %c0_7] : memref<18x128xf32, #tpu.memory_space<vmem>>, vector<1x128xf32>
    %c16 = arith.constant 16 : index
    %c0_8 = arith.constant 0 : index
    %8 = vector.load %arg1[%c16, %c0_8] : memref<18x128xf32, #tpu.memory_space<vmem>>, vector<1x128xf32>
    %c1 = arith.constant 1 : index
    %c0_9 = arith.constant 0 : index
    %9 = vector.load %arg1[%c1, %c0_9] : memref<18x128xf32, #tpu.memory_space<vmem>>, vector<1x128xf32>
    %c3 = arith.constant 3 : index
    %c0_10 = arith.constant 0 : index
    %10 = vector.load %arg1[%c3, %c0_10] : memref<18x128xf32, #tpu.memory_space<vmem>>, vector<1x128xf32>
    %c5 = arith.constant 5 : index
    %c0_11 = arith.constant 0 : index
    %11 = vector.load %arg1[%c5, %c0_11] : memref<18x128xf32, #tpu.memory_space<vmem>>, vector<1x128xf32>
    %c7 = arith.constant 7 : index
    %c0_12 = arith.constant 0 : index
    %12 = vector.load %arg1[%c7, %c0_12] : memref<18x128xf32, #tpu.memory_space<vmem>>, vector<1x128xf32>
    %c9 = arith.constant 9 : index
    %c0_13 = arith.constant 0 : index
    %13 = vector.load %arg1[%c9, %c0_13] : memref<18x128xf32, #tpu.memory_space<vmem>>, vector<1x128xf32>
    %c11 = arith.constant 11 : index
    %c0_14 = arith.constant 0 : index
    %14 = vector.load %arg1[%c11, %c0_14] : memref<18x128xf32, #tpu.memory_space<vmem>>, vector<1x128xf32>
    %c13 = arith.constant 13 : index
    %c0_15 = arith.constant 0 : index
    %15 = vector.load %arg1[%c13, %c0_15] : memref<18x128xf32, #tpu.memory_space<vmem>>, vector<1x128xf32>
    %c15 = arith.constant 15 : index
    %c0_16 = arith.constant 0 : index
    %16 = vector.load %arg1[%c15, %c0_16] : memref<18x128xf32, #tpu.memory_space<vmem>>, vector<1x128xf32>
    %c17 = arith.constant 17 : index
    %c0_17 = arith.constant 0 : index
    %17 = vector.load %arg1[%c17, %c0_17] : memref<18x128xf32, #tpu.memory_space<vmem>>, vector<1x128xf32>
    %c0_18 = arith.constant 0 : index
    %c0_19 = arith.constant 0 : index
    %18 = vector.load %arg2[%c0_18, %c0_19] : memref<8x128xf32, #tpu.memory_space<vmem>>, vector<1x128xf32>
    %c2_20 = arith.constant 2 : index
    %c0_21 = arith.constant 0 : index
    %19 = vector.load %arg2[%c2_20, %c0_21] : memref<8x128xf32, #tpu.memory_space<vmem>>, vector<1x128xf32>
    %c4_22 = arith.constant 4 : index
    %c0_23 = arith.constant 0 : index
    %20 = vector.load %arg2[%c4_22, %c0_23] : memref<8x128xf32, #tpu.memory_space<vmem>>, vector<1x128xf32>
    %c6_24 = arith.constant 6 : index
    %c0_25 = arith.constant 0 : index
    %21 = vector.load %arg2[%c6_24, %c0_25] : memref<8x128xf32, #tpu.memory_space<vmem>>, vector<1x128xf32>
    %c1_26 = arith.constant 1 : index
    %c0_27 = arith.constant 0 : index
    %22 = vector.load %arg2[%c1_26, %c0_27] : memref<8x128xf32, #tpu.memory_space<vmem>>, vector<1x128xf32>
    %c3_28 = arith.constant 3 : index
    %c0_29 = arith.constant 0 : index
    %23 = vector.load %arg2[%c3_28, %c0_29] : memref<8x128xf32, #tpu.memory_space<vmem>>, vector<1x128xf32>
    %c5_30 = arith.constant 5 : index
    %c0_31 = arith.constant 0 : index
    %24 = vector.load %arg2[%c5_30, %c0_31] : memref<8x128xf32, #tpu.memory_space<vmem>>, vector<1x128xf32>
    %c7_32 = arith.constant 7 : index
    %c0_33 = arith.constant 0 : index
    %25 = vector.load %arg2[%c7_32, %c0_33] : memref<8x128xf32, #tpu.memory_space<vmem>>, vector<1x128xf32>
    %26 = arith.addf %0, %1 : vector<1x128xf32>
    %27 = arith.addf %26, %2 : vector<1x128xf32>
    %28 = arith.addf %27, %3 : vector<1x128xf32>
    %29 = arith.addf %28, %4 : vector<1x128xf32>
    %30 = arith.addf %29, %5 : vector<1x128xf32>
    %31 = arith.addf %30, %6 : vector<1x128xf32>
    %32 = arith.addf %31, %7 : vector<1x128xf32>
    %33 = arith.addf %32, %8 : vector<1x128xf32>
    %cst = arith.constant 0.111111112 : f32
    %34 = vector.broadcast %cst : f32 to vector<1x128xf32>
    %35 = arith.mulf %33, %34 : vector<1x128xf32>
    %36 = arith.addf %9, %10 : vector<1x128xf32>
    %37 = arith.addf %36, %11 : vector<1x128xf32>
    %38 = arith.addf %37, %12 : vector<1x128xf32>
    %39 = arith.addf %38, %13 : vector<1x128xf32>
    %40 = arith.addf %39, %14 : vector<1x128xf32>
    %41 = arith.addf %40, %15 : vector<1x128xf32>
    %42 = arith.addf %41, %16 : vector<1x128xf32>
    %43 = arith.addf %42, %17 : vector<1x128xf32>
    %cst_34 = arith.constant 0.111111112 : f32
    %44 = vector.broadcast %cst_34 : f32 to vector<1x128xf32>
    %45 = arith.mulf %43, %44 : vector<1x128xf32>
    %46 = arith.subf %0, %35 : vector<1x128xf32>
    %47 = arith.subf %1, %35 : vector<1x128xf32>
    %48 = arith.subf %2, %35 : vector<1x128xf32>
    %49 = arith.subf %3, %35 : vector<1x128xf32>
    %50 = arith.subf %4, %35 : vector<1x128xf32>
    %51 = arith.subf %5, %35 : vector<1x128xf32>
    %52 = arith.subf %6, %35 : vector<1x128xf32>
    %53 = arith.subf %7, %35 : vector<1x128xf32>
    %54 = arith.subf %8, %35 : vector<1x128xf32>
    %55 = arith.subf %9, %45 : vector<1x128xf32>
    %56 = arith.subf %10, %45 : vector<1x128xf32>
    %57 = arith.subf %11, %45 : vector<1x128xf32>
    %58 = arith.subf %12, %45 : vector<1x128xf32>
    %59 = arith.subf %13, %45 : vector<1x128xf32>
    %60 = arith.subf %14, %45 : vector<1x128xf32>
    %61 = arith.subf %15, %45 : vector<1x128xf32>
    %62 = arith.subf %16, %45 : vector<1x128xf32>
    %63 = arith.subf %17, %45 : vector<1x128xf32>
    %64 = arith.mulf %46, %46 : vector<1x128xf32>
    %65 = arith.mulf %47, %47 : vector<1x128xf32>
    %66 = arith.mulf %48, %48 : vector<1x128xf32>
    %67 = arith.mulf %49, %49 : vector<1x128xf32>
    %68 = arith.mulf %50, %50 : vector<1x128xf32>
    %69 = arith.mulf %51, %51 : vector<1x128xf32>
    %70 = arith.mulf %52, %52 : vector<1x128xf32>
    %71 = arith.mulf %53, %53 : vector<1x128xf32>
    %72 = arith.mulf %54, %54 : vector<1x128xf32>
    %73 = arith.addf %64, %65 : vector<1x128xf32>
    %74 = arith.addf %73, %66 : vector<1x128xf32>
    %75 = arith.addf %74, %67 : vector<1x128xf32>
    %76 = arith.addf %75, %68 : vector<1x128xf32>
    %77 = arith.addf %76, %69 : vector<1x128xf32>
    %78 = arith.addf %77, %70 : vector<1x128xf32>
    %79 = arith.addf %78, %71 : vector<1x128xf32>
    %80 = arith.addf %79, %72 : vector<1x128xf32>
    %cst_35 = arith.constant 0.111111112 : f32
    %81 = vector.broadcast %cst_35 : f32 to vector<1x128xf32>
    %82 = arith.mulf %80, %81 : vector<1x128xf32>
    %83 = arith.mulf %46, %55 : vector<1x128xf32>
    %84 = arith.mulf %47, %56 : vector<1x128xf32>
    %85 = arith.mulf %48, %57 : vector<1x128xf32>
    %86 = arith.mulf %49, %58 : vector<1x128xf32>
    %87 = arith.mulf %50, %59 : vector<1x128xf32>
    %88 = arith.mulf %51, %60 : vector<1x128xf32>
    %89 = arith.mulf %52, %61 : vector<1x128xf32>
    %90 = arith.mulf %53, %62 : vector<1x128xf32>
    %91 = arith.mulf %54, %63 : vector<1x128xf32>
    %92 = arith.addf %83, %84 : vector<1x128xf32>
    %93 = arith.addf %92, %85 : vector<1x128xf32>
    %94 = arith.addf %93, %86 : vector<1x128xf32>
    %95 = arith.addf %94, %87 : vector<1x128xf32>
    %96 = arith.addf %95, %88 : vector<1x128xf32>
    %97 = arith.addf %96, %89 : vector<1x128xf32>
    %98 = arith.addf %97, %90 : vector<1x128xf32>
    %99 = arith.addf %98, %91 : vector<1x128xf32>
    %cst_36 = arith.constant 0.111111112 : f32
    %100 = vector.broadcast %cst_36 : f32 to vector<1x128xf32>
    %101 = arith.mulf %99, %100 : vector<1x128xf32>
    %102 = arith.mulf %55, %55 : vector<1x128xf32>
    %103 = arith.mulf %56, %56 : vector<1x128xf32>
    %104 = arith.mulf %57, %57 : vector<1x128xf32>
    %105 = arith.mulf %58, %58 : vector<1x128xf32>
    %106 = arith.mulf %59, %59 : vector<1x128xf32>
    %107 = arith.mulf %60, %60 : vector<1x128xf32>
    %108 = arith.mulf %61, %61 : vector<1x128xf32>
    %109 = arith.mulf %62, %62 : vector<1x128xf32>
    %110 = arith.mulf %63, %63 : vector<1x128xf32>
    %111 = arith.addf %102, %103 : vector<1x128xf32>
    %112 = arith.addf %111, %104 : vector<1x128xf32>
    %113 = arith.addf %112, %105 : vector<1x128xf32>
    %114 = arith.addf %113, %106 : vector<1x128xf32>
    %115 = arith.addf %114, %107 : vector<1x128xf32>
    %116 = arith.addf %115, %108 : vector<1x128xf32>
    %117 = arith.addf %116, %109 : vector<1x128xf32>
    %118 = arith.addf %117, %110 : vector<1x128xf32>
    %cst_37 = arith.constant 0.111111112 : f32
    %119 = vector.broadcast %cst_37 : f32 to vector<1x128xf32>
    %120 = arith.mulf %118, %119 : vector<1x128xf32>
    %121 = arith.addf %18, %19 : vector<1x128xf32>
    %122 = arith.addf %121, %20 : vector<1x128xf32>
    %123 = arith.addf %122, %21 : vector<1x128xf32>
    %cst_38 = arith.constant 2.500000e-01 : f32
    %124 = vector.broadcast %cst_38 : f32 to vector<1x128xf32>
    %125 = arith.mulf %123, %124 : vector<1x128xf32>
    %126 = arith.addf %22, %23 : vector<1x128xf32>
    %127 = arith.addf %126, %24 : vector<1x128xf32>
    %128 = arith.addf %127, %25 : vector<1x128xf32>
    %cst_39 = arith.constant 2.500000e-01 : f32
    %129 = vector.broadcast %cst_39 : f32 to vector<1x128xf32>
    %130 = arith.mulf %128, %129 : vector<1x128xf32>
    %131 = arith.subf %19, %18 : vector<1x128xf32>
    %132 = arith.subf %23, %22 : vector<1x128xf32>
    %133 = arith.subf %20, %19 : vector<1x128xf32>
    %134 = arith.subf %24, %23 : vector<1x128xf32>
    %135 = arith.mulf %131, %131 : vector<1x128xf32>
    %136 = arith.mulf %132, %132 : vector<1x128xf32>
    %137 = arith.addf %135, %136 : vector<1x128xf32>
    %138 = arith.mulf %133, %133 : vector<1x128xf32>
    %139 = arith.mulf %134, %134 : vector<1x128xf32>
    %140 = arith.addf %138, %139 : vector<1x128xf32>
    %cst_40 = arith.constant 9.99999996E-13 : f32
    %141 = vector.broadcast %cst_40 : f32 to vector<1x128xf32>
    %142 = arith.maximumf %137, %141 : vector<1x128xf32>
    %143 = tpu.reciprocal %142 {approx = true} : vector<1x128xf32> -> vector<1x128xf32>
    %144 = arith.mulf %131, %131 : vector<1x128xf32>
    %145 = arith.mulf %140, %132 : vector<1x128xf32>
    %146 = arith.mulf %145, %132 : vector<1x128xf32>
    %147 = arith.mulf %146, %143 : vector<1x128xf32>
    %148 = arith.addf %144, %147 : vector<1x128xf32>
    %cst_41 = arith.constant 0.027777778 : f32
    %149 = vector.broadcast %cst_41 : f32 to vector<1x128xf32>
    %150 = arith.mulf %148, %149 : vector<1x128xf32>
    %151 = arith.mulf %131, %132 : vector<1x128xf32>
    %152 = arith.mulf %140, %143 : vector<1x128xf32>
    %cst_42 = arith.constant 1.000000e+00 : f32
    %153 = vector.broadcast %cst_42 : f32 to vector<1x128xf32>
    %154 = arith.subf %153, %152 : vector<1x128xf32>
    %155 = arith.mulf %151, %154 : vector<1x128xf32>
    %cst_43 = arith.constant 0.027777778 : f32
    %156 = vector.broadcast %cst_43 : f32 to vector<1x128xf32>
    %157 = arith.mulf %155, %156 : vector<1x128xf32>
    %158 = arith.mulf %132, %132 : vector<1x128xf32>
    %159 = arith.mulf %140, %131 : vector<1x128xf32>
    %160 = arith.mulf %159, %131 : vector<1x128xf32>
    %161 = arith.mulf %160, %143 : vector<1x128xf32>
    %162 = arith.addf %158, %161 : vector<1x128xf32>
    %cst_44 = arith.constant 0.027777778 : f32
    %163 = vector.broadcast %cst_44 : f32 to vector<1x128xf32>
    %164 = arith.mulf %162, %163 : vector<1x128xf32>
    %165 = arith.subf %35, %125 : vector<1x128xf32>
    %166 = arith.subf %45, %130 : vector<1x128xf32>
    %167 = arith.mulf %165, %165 : vector<1x128xf32>
    %168 = arith.mulf %166, %166 : vector<1x128xf32>
    %169 = arith.addf %167, %168 : vector<1x128xf32>
    %170 = arith.addf %82, %120 : vector<1x128xf32>
    %171 = arith.addf %170, %150 : vector<1x128xf32>
    %172 = arith.addf %171, %164 : vector<1x128xf32>
    %173 = arith.mulf %82, %150 : vector<1x128xf32>
    %cst_45 = arith.constant 2.000000e+00 : f32
    %174 = vector.broadcast %cst_45 : f32 to vector<1x128xf32>
    %175 = arith.mulf %174, %101 : vector<1x128xf32>
    %176 = arith.mulf %175, %157 : vector<1x128xf32>
    %177 = arith.addf %173, %176 : vector<1x128xf32>
    %178 = arith.mulf %120, %164 : vector<1x128xf32>
    %179 = arith.addf %177, %178 : vector<1x128xf32>
    %180 = arith.mulf %82, %120 : vector<1x128xf32>
    %181 = arith.mulf %101, %101 : vector<1x128xf32>
    %182 = arith.subf %180, %181 : vector<1x128xf32>
    %183 = arith.mulf %150, %164 : vector<1x128xf32>
    %184 = arith.mulf %157, %157 : vector<1x128xf32>
    %185 = arith.subf %183, %184 : vector<1x128xf32>
    %186 = arith.mulf %182, %185 : vector<1x128xf32>
    %cst_46 = arith.constant 0.000000e+00 : f32
    %187 = vector.broadcast %cst_46 : f32 to vector<1x128xf32>
    %188 = arith.maximumf %186, %187 : vector<1x128xf32>
    %189 = math.sqrt %188 : vector<1x128xf32>
    %cst_47 = arith.constant 2.000000e+00 : f32
    %190 = vector.broadcast %cst_47 : f32 to vector<1x128xf32>
    %191 = arith.mulf %190, %189 : vector<1x128xf32>
    %192 = arith.addf %179, %191 : vector<1x128xf32>
    %cst_48 = arith.constant 0.000000e+00 : f32
    %193 = vector.broadcast %cst_48 : f32 to vector<1x128xf32>
    %194 = arith.maximumf %192, %193 : vector<1x128xf32>
    %195 = math.sqrt %194 : vector<1x128xf32>
    %cst_49 = arith.constant 2.000000e+00 : f32
    %196 = vector.broadcast %cst_49 : f32 to vector<1x128xf32>
    %197 = arith.mulf %196, %195 : vector<1x128xf32>
    %198 = arith.subf %172, %197 : vector<1x128xf32>
    %199 = arith.addf %169, %198 : vector<1x128xf32>
    %cst_50 = arith.constant 9.99999997E-7 : f32
    %200 = vector.broadcast %cst_50 : f32 to vector<1x128xf32>
    %201 = arith.maximumf %199, %200 : vector<1x128xf32>
    %202 = math.log1p %201 : vector<1x128xf32>
    %cst_51 = arith.constant 1.000000e+00 : f32
    %203 = vector.broadcast %cst_51 : f32 to vector<1x128xf32>
    %204 = arith.addf %203, %202 : vector<1x128xf32>
    %205 = tpu.reciprocal %204 {approx = true} : vector<1x128xf32> -> vector<1x128xf32>
    %206 = arith.mulf %202, %205 : vector<1x128xf32>
    %c0_52 = arith.constant 0 : index
    %c0_53 = arith.constant 0 : index
    %207 = vector.load %arg3[%c0_52, %c0_53] : memref<1x128xf32, #tpu.memory_space<vmem>>, vector<1x128xf32>
    tpu.vector_store %arg3[%c0_52, %c0_53], %206 {strides = array<i32>} : memref<1x128xf32, #tpu.memory_space<vmem>>, vector<1x128xf32>,
    return
  }
  func.func @transform_0(%arg0: i32) -> (i32, i32) {
    %c0_i32 = arith.constant 0 : i32
    %c0_i32_0 = arith.constant 0 : i32
    return %c0_i32, %arg0 : i32, i32
  }
  func.func @transform_1(%arg0: i32) -> (i32, i32) {
    %c0_i32 = arith.constant 0 : i32
    %c0_i32_0 = arith.constant 0 : i32
    return %c0_i32, %arg0 : i32, i32
  }
  func.func @transform_2(%arg0: i32) -> (i32, i32) {
    %c0_i32 = arith.constant 0 : i32
    %c0_i32_0 = arith.constant 0 : i32
    return %c0_i32, %arg0 : i32, i32
  }
}

</mosaic_0001>

<bundles_post_ra>
// kernel: tpu_custom_call.1
= control target key start
LH: loop header
LB: loop body
LE: loop exit
PB: predicated region body
PF: predicated region fallthrough
CT: control target
= control target key end

     0   :  { %7 = vsyncpa [#allocation3], 0  ;;  %s455_s0 = inlined_call_operand.hbm [shape: f32[18,128], index: 0, kind: input, shape index: {}]   ;;  %s456_s1 = inlined_call_operand.hbm [shape: f32[8,128], index: 1, kind: input, shape index: {}]   ;;  %s457_s2 = inlined_call_operand.hbm [shape: f32[1,128], index: 2, kind: output, shape index: {}]  }
   0x1   :  { %8 = vsyncpa [#allocation6], 0 }
   0x2   :  { %9 = vsyncpa [#allocation4], 0  ;;  %s14_s11 = sshll.u32 %s455_s0, 4  ;;  %s370_s12 = smov [#allocation2]   ;;  %s15_s11 = int_to_ptr.hbm [resolvable:$true] %s14_s11 }
   0x3   :  { %s16_s13 = sshll.u32 %s370_s12, 4  ;;  %s28_s16 = sshll.u32 %s456_s1, 4  ;;  %s17_s13 = int_to_ptr.vmem [resolvable:$true] %s16_s13  ;;  %s29_s16 = int_to_ptr.hbm [resolvable:$true] %s28_s16 }
   0x4   :  { %s371_s17 = smov 128   ;;  %s372_s18 = smov 8  }
   0x5   :  { %22 = dma.hbm_to_vmem [thread:$0]  %s15_s11, 384, %s17_s13, [#allocation3], %s371_s17, %s371_s17, %s372_s18  }
   0x6   :  { %s373_s19 = smov [#allocation5]  }
   0x7   :  { %s30_s20 = sshll.u32 %s373_s19, 4  ;;  %s31_s20 = int_to_ptr.vmem [resolvable:$true] %s30_s20 }
   0x8   :  { %33 = dma.hbm_to_vmem [thread:$0]  %s29_s16, 128, %s31_s20, [#allocation6]  }
   0x9   :  { %364 = dma.done.wait [#allocation3], 384  }
   0xa   :  { %365 = vsyncadd [#allocation3], 4294966912 }
   0xb   :  { %366 = dma.done.wait [#allocation6], 128  }
   0xc   :  { %367 = vsyncadd [#allocation6], 4294967168  ;;  %v42_v0 = vld [vmem:[#allocation2] sm:$0x1]  ;;  %v43_v1 = vld [vmem:[#allocation2 + $0x2] sm:$0x1] }
   0xd   :  { %v44_v2 = vld [vmem:[#allocation2 + $0x4] sm:$0x1]  ;;  %v68_v3 = vadd.f32 %v43_v1, %v42_v0  ;;  %v45_v4 = vld [vmem:[#allocation2 + $0x6] sm:$0x1]  ;;  %v396_v5 = vld [vmem:[#allocation2 + $0x1] sm:$0x1] }
   0xe   :  { %v398_v6 = vld [vmem:[#allocation2 + $0x3] sm:$0x1]  ;;  %v400_v7 = vld [vmem:[#allocation2 + $0x5] sm:$0x1]  ;;  %v46_v9 = vld [vmem:[#allocation2 + $0x8] sm:$0x1] }
   0xf   :  { %v69_v8 = vadd.f32 %v68_v3, %v44_v2  ;;  %v77_v10 = vadd.f32 %v398_v6, %v396_v5  ;;  %v47_v11 = vld [vmem:[#allocation2 + $0xa] sm:$0x1]  ;;  %v404_v12 = vld [vmem:[#allocation2 + $0x7] sm:$0x1]  ;;  %v60_v14 = vld [vmem:[#allocation5] sm:$0x1] }
  0x10   :  { %v61_v15 = vld [vmem:[#allocation5 + $0x2] sm:$0x1]  ;;  %v62_v16 = vld [vmem:[#allocation5 + $0x4] sm:$0x1]  ;;  %v55_v18 = vld [vmem:[#allocation2 + $0x9] sm:$0x1] }
  0x11   :  { %v70_v13 = vadd.f32 %v69_v8, %v45_v4  ;;  %v78_v17 = vadd.f32 %v77_v10, %v400_v7  ;;  %v64_v19 = vld [vmem:[#allocation5 + $0x1] sm:$0x1]  ;;  %v65_v20 = vld [vmem:[#allocation5 + $0x3] sm:$0x1]  ;;  %v166_v22 = vsub.f32 %v61_v15, %v60_v14  ;;  %v168_v23 = vsub.f32 %v62_v16, %v61_v15  ;;  %v48_v24 = vld [vmem:[#allocation2 + $0xc] sm:$0x1] }
  0x12   :  { %v66_v25 = vld [vmem:[#allocation5 + $0x5] sm:$0x1]  ;;  %v167_v27 = vsub.f32 %v65_v20, %v64_v19  ;;  %v56_v28 = vld [vmem:[#allocation2 + $0xb] sm:$0x1]  ;;  %v49_v33 = vld [vmem:[#allocation2 + $0xe] sm:$0x1]  ;;  %v158_v48 = vadd.f32 %v61_v15, %v60_v14  ;;  %v162_v49 = vadd.f32 %v65_v20, %v64_v19 }
  0x13   :  { %v71_v21 = vadd.f32 %v70_v13, %v46_v9  ;;  %v79_v26 = vadd.f32 %v78_v17, %v404_v12  ;;  %v169_v30 = vsub.f32 %v66_v25, %v65_v20  ;;  %v408_v31 = vmul.f32 %v166_v22, %v166_v22  ;;  %v57_v36 = vld [vmem:[#allocation2 + $0xd] sm:$0x1]  ;;  %v50_v39 = vld [vmem:[#allocation2 + $0x10] sm:$0x1]  ;;  %v58_v42 = vld [vmem:[#allocation2 + $0xf] sm:$0x1] }
  0x14   :  { %v173_v32 = vmul.f32 %v168_v23, %v168_v23  ;;  %v410_v35 = vmul.f32 %v167_v27, %v167_v27  ;;  %v59_v46 = vld [vmem:[#allocation2 + $0x11] sm:$0x1]  ;;  %v159_v55 = vadd.f32 %v158_v48, %v62_v16  ;;  %v163_v56 = vadd.f32 %v162_v49, %v66_v25  ;;  %s374_s0 = smov [#allocation7]   ;;  %s266_s23 = sshll.u32 %s457_s2, 4  ;;  %s267_s23 = int_to_ptr.hbm [resolvable:$true] %s266_s23 }
  0x15   :  { %v72_v29 = vadd.f32 %v71_v21, %v47_v11  ;;  %v80_v34 = vadd.f32 %v79_v26, %v55_v18  ;;  %v174_v38 = vmul.f32 %v169_v30, %v169_v30  ;;  %v422_v60 = vmul.f32 %v167_v27, %v166_v22  ;;  %s264_s1 = sshll.u32 %s374_s0, 4  ;;  %s265_s1 = int_to_ptr.vmem [resolvable:$true] %s264_s1 }
  0x16   :  { %v172_v41 = vadd.f32 %v410_v35, %v408_v31 }
  0x17   :  { %v73_v37 = vadd.f32 %v72_v29, %v48_v24  ;;  %v81_v40 = vadd.f32 %v80_v34, %v56_v28  ;;  %v414_v44 = vadd.f32 %v174_v38, %v173_v32 }
  0x18   :  { %v176_v50 = vmax.f32 %v172_v41, 1e-12 }
  0x19   :  { %v74_v43 = vadd.f32 %v73_v37, %v49_v33  ;;  %v82_v45 = vadd.f32 %v81_v40, %v57_v36  ;;  %v178_v52 = vmul.f32 %v414_v44, %v167_v27  ;;  %v188_v53 = vmul.f32 %v414_v44, %v166_v22  ;;  %v67_v37 = vld [vmem:[#allocation5 + $0x7] sm:$0x1] }
  0x1a   :  { %282 = vrcp.f32 %v176_v50 }
  0x1b   :  { %v75_v47 = vadd.f32 %v74_v43, %v50_v39  ;;  %v83_v51 = vadd.f32 %v82_v45, %v58_v42  ;;  %v179_v63 = vmul.f32 %v178_v52, %v167_v27  ;;  %v189_v3 = vmul.f32 %v188_v53, %v166_v22 }
  0x1d   :  { %v418_v54 = vmul.f32 0.11111111, %v75_v47  ;;  %v84_v57 = vadd.f32 %v83_v51, %v59_v46 }
  0x1f   :  { %v86_v58 = vsub.f32 %v42_v0, %v418_v54  ;;  %v87_v59 = vsub.f32 %v43_v1, %v418_v54  ;;  %v424_v61 = vmul.f32 0.11111111, %v84_v57  ;;  %v88_v62 = vsub.f32 %v44_v2, %v418_v54 }
  0x20   :  { %v89_v8 = vsub.f32 %v45_v4, %v418_v54  ;;  %v90_v10 = vsub.f32 %v46_v9, %v418_v54  ;;  %v91_v13 = vsub.f32 %v47_v11, %v418_v54  ;;  %v92_v2 = vsub.f32 %v48_v24, %v418_v54  ;;  %v283_v20 = vpop.eup %282 }
  0x21   :  { %v104_v14 = vmul.f32 %v86_v58, %v86_v58  ;;  %v95_v0 = vsub.f32 %v396_v5, %v424_v61  ;;  %v96_v1 = vsub.f32 %v398_v6, %v424_v61  ;;  %v97_v15 = vsub.f32 %v400_v7, %v424_v61 }
  0x22   :  { %v105_v16 = vmul.f32 %v87_v59, %v87_v59  ;;  %v93_v17 = vsub.f32 %v49_v33, %v418_v54  ;;  %v94_v4 = vsub.f32 %v50_v39, %v418_v54  ;;  %v98_v9 = vsub.f32 %v404_v12, %v424_v61 }
  0x23   :  { %v99_v11 = vsub.f32 %v55_v18, %v424_v61  ;;  %v100_v5 = vsub.f32 %v56_v28, %v424_v61  ;;  %v101_v19 = vsub.f32 %v57_v36, %v424_v61  ;;  %v106_v6 = vmul.f32 %v88_v62, %v88_v62  ;;  %v63_v36 = vld [vmem:[#allocation5 + $0x6] sm:$0x1] }
  0x24   :  { %v102_v7 = vsub.f32 %v58_v42, %v424_v61  ;;  %v103_v21 = vsub.f32 %v59_v46, %v424_v61  ;;  %v107_v22 = vmul.f32 %v89_v8, %v89_v8  ;;  %v108_v23 = vmul.f32 %v90_v10, %v90_v10 }
  0x25   :  { %v113_v24 = vadd.f32 %v105_v16, %v104_v14  ;;  %v122_v25 = vmul.f32 %v95_v0, %v86_v58  ;;  %v123_v26 = vmul.f32 %v96_v1, %v87_v59  ;;  %v124_v27 = vmul.f32 %v97_v15, %v88_v62 }
  0x26   :  { %v109_v29 = vmul.f32 %v91_v13, %v91_v13  ;;  %v110_v12 = vmul.f32 %v92_v2, %v92_v2  ;;  %v111_v30 = vmul.f32 %v93_v17, %v93_v17  ;;  %v112_v18 = vmul.f32 %v94_v4, %v94_v4 }
  0x27   :  { %v114_v32 = vadd.f32 %v113_v24, %v106_v6  ;;  %v125_v28 = vmul.f32 %v98_v9, %v89_v8  ;;  %v126_v33 = vmul.f32 %v99_v11, %v90_v10  ;;  %v131_v34 = vadd.f32 %v123_v26, %v122_v25 }
  0x28   :  { %v127_v38 = vmul.f32 %v100_v5, %v91_v13  ;;  %v140_v39 = vmul.f32 %v95_v0, %v95_v0  ;;  %v141_v40 = vmul.f32 %v96_v1, %v96_v1  ;;  %v142_v41 = vmul.f32 %v97_v15, %v97_v15 }
  0x29   :  { %v115_v42 = vadd.f32 %v114_v32, %v107_v22  ;;  %v128_v43 = vmul.f32 %v101_v19, %v92_v2  ;;  %v129_v45 = vmul.f32 %v102_v7, %v93_v17  ;;  %v132_v46 = vadd.f32 %v131_v34, %v124_v27 }
  0x2a   :  { %v130_v47 = vmul.f32 %v103_v21, %v94_v4  ;;  %v143_v48 = vmul.f32 %v98_v9, %v98_v9  ;;  %v144_v49 = vmul.f32 %v99_v11, %v99_v11  ;;  %v149_v50 = vadd.f32 %v141_v40, %v140_v39 }
  0x2b   :  { %v116_v51 = vadd.f32 %v115_v42, %v108_v23  ;;  %v133_v52 = vadd.f32 %v132_v46, %v125_v28  ;;  %v160_v53 = vadd.f32 %v159_v55, %v63_v36  ;;  %v164_v57 = vadd.f32 %v163_v56, %v67_v37 }
  0x2c   :  { %v150_v58 = vadd.f32 %v149_v50, %v142_v41  ;;  %v180_v59 = vmul.f32 %v283_v20, %v179_v63  ;;  %v184_v62 = vmul.f32 %v283_v20, %v414_v44  ;;  %v190_v8 = vmul.f32 %v283_v20, %v189_v3 }
  0x2d   :  { %v117_v10 = vadd.f32 %v116_v51, %v109_v29  ;;  %v134_v13 = vadd.f32 %v133_v52, %v126_v33  ;;  %v161_v14 = vmul.f32 0.25, %v160_v53  ;;  %v165_v0 = vmul.f32 0.25, %v164_v57 }
  0x2e   :  { %v145_v1 = vmul.f32 %v100_v5, %v100_v5  ;;  %v151_v15 = vadd.f32 %v150_v58, %v143_v48  ;;  %v181_v16 = vadd.f32 %v180_v59, %v408_v31  ;;  %v185_v2 = vsub.f32 1.0, %v184_v62 }
  0x2f   :  { %v118_v17 = vadd.f32 %v117_v10, %v110_v12  ;;  %v135_v4 = vadd.f32 %v134_v13, %v127_v38  ;;  %v193_v9 = vsub.f32 %v418_v54, %v161_v14  ;;  %v194_v55 = vsub.f32 %v424_v61, %v165_v0 }
  0x30   :  { %v146_v56 = vmul.f32 %v101_v19, %v101_v19  ;;  %v152_v63 = vadd.f32 %v151_v15, %v144_v49  ;;  %v186_v44 = vmul.f32 %v185_v2, %v422_v60  ;;  %v191_v3 = vadd.f32 %v190_v8, %v410_v35 }
  0x31   :  { %v119_v11 = vadd.f32 %v118_v17, %v111_v30  ;;  %v136_v6 = vadd.f32 %v135_v4, %v128_v43  ;;  %v195_v20 = vmul.f32 %v193_v9, %v193_v9  ;;  %v196_v5 = vmul.f32 %v194_v55, %v194_v55 }
  0x32   :  { %v147_v22 = vmul.f32 %v102_v7, %v102_v7  ;;  %v153_v23 = vadd.f32 %v152_v63, %v145_v1  ;;  %v148_v24 = vmul.f32 %v103_v21, %v103_v21  ;;  %v182_v25 = vmul.f32 0.027777778, %v181_v16 }
  0x33   :  { %v137_v31 = vadd.f32 %v136_v6, %v129_v45  ;;  %v197_v26 = vadd.f32 %v196_v5, %v195_v20  ;;  %v120_v27 = vadd.f32 %v119_v11, %v112_v18  ;;  %v187_v29 = vmul.f32 0.027777778, %v186_v44 }
  0x34   :  { %v154_v54 = vadd.f32 %v153_v23, %v146_v56  ;;  %v192_v61 = vmul.f32 0.027777778, %v191_v3 }
  0x35   :  { %v138_v19 = vadd.f32 %v137_v31, %v130_v47  ;;  %v121_v60 = vmul.f32 0.11111111, %v120_v27  ;;  %v211_v30 = vmul.f32 %v187_v29, %v187_v29 }
  0x36   :  { %v155_v12 = vadd.f32 %v154_v54, %v147_v22  ;;  %v210_v35 = vmul.f32 %v192_v61, %v182_v25 }
  0x37   :  { %v139_v32 = vmul.f32 0.11111111, %v138_v19  ;;  %v201_v42 = vmul.f32 %v182_v25, %v121_v60 }
  0x38   :  { %v156_v28 = vadd.f32 %v155_v12, %v148_v24  ;;  %v212_v7 = vsub.f32 %v210_v35, %v211_v30 }
  0x39   :  { %v208_v34 = vmul.f32 %v139_v32, %v139_v32  ;;  %v202_v18 = vmul.f32 2.0, %v139_v32 }
  0x3a   :  { %v157_v33 = vmul.f32 0.11111111, %v156_v28 }
  0x3b   :  { %v203_v43 = vmul.f32 %v202_v18, %v187_v29 }
  0x3c   :  { %v207_v36 = vmul.f32 %v157_v33, %v121_v60  ;;  %v205_v48 = vmul.f32 %v192_v61, %v157_v33  ;;  %v198_v14 = vadd.f32 %v157_v33, %v121_v60 }
  0x3d   :  { %v204_v47 = vadd.f32 %v203_v43, %v201_v42 }
  0x3e   :  { %v209_v37 = vsub.f32 %v207_v36, %v208_v34  ;;  %v199_v15 = vadd.f32 %v198_v14, %v182_v25 }
  0x3f   :  { %v206_v52 = vadd.f32 %v205_v48, %v204_v47 }
  0x40   :  { %v213_v38 = vmul.f32 %v212_v7, %v209_v37  ;;  %v200_v4 = vadd.f32 %v199_v15, %v192_v61 }
  0x42   :  { %v214_v21 = vmax.f32 %v213_v38, 0.0 }
  0x44   :  { %284 = vrsqrt.f32 %v214_v21  ;;  %vm222_vm0 = vcmp.eq.f32.partialorder %v214_v21, inf  ;;  %v225_v50 = vand.u32 2147483648, %v214_v21  ;;  %vm224_vm1 = vcmp.eq.f32.partialorder %v214_v21, 0.0 }
  0x4a   :  { %v285_v39 = vpop.eup %284 }
  0x4b   :  { %v216_v40 = vmul.f32 %v285_v39, %v214_v21 }
  0x4d   :  { %v217_v41 = vmul.f32 %v285_v39, %v216_v40 }
  0x4f   :  { %v218_v45 = vmul.f32 0.5, %v217_v41 }
  0x51   :  { %v219_v46 = vsub.f32 1.5, %v218_v45 }
  0x53   :  { %v220_v49 = vmul.f32 %v285_v39, %v219_v46 }
  0x55   :  { %v221_v51 = vmul.f32 %v220_v49, %v214_v21 }
  0x57   :  { %v223_v53 = vsel %vm222_vm0, %v214_v21, %v221_v51 }
  0x58   :  { %v226_v57 = vsel %vm224_vm1, %v225_v50, %v223_v53 }
  0x59   :  { %v227_v58 = vmul.f32 2.0, %v226_v57 }
  0x5b   :  { %v228_v59 = vadd.f32 %v227_v58, %v206_v52 }
  0x5d   :  { %v229_v62 = vmax.f32 %v228_v59, 0.0 }
  0x5f   :  { %286 = vrsqrt.f32 %v229_v62  ;;  %vm237_vm2 = vcmp.eq.f32.partialorder %v229_v62, inf  ;;  %v240_v2 = vand.u32 2147483648, %v229_v62  ;;  %vm239_vm3 = vcmp.eq.f32.partialorder %v229_v62, 0.0 }
  0x65   :  { %v287_v8 = vpop.eup %286 }
  0x66   :  { %v231_v10 = vmul.f32 %v287_v8, %v229_v62 }
  0x68   :  { %v232_v13 = vmul.f32 %v287_v8, %v231_v10 }
  0x6a   :  { %v233_v0 = vmul.f32 0.5, %v232_v13 }
  0x6c   :  { %v234_v1 = vsub.f32 1.5, %v233_v0 }
  0x6e   :  { %v235_v16 = vmul.f32 %v287_v8, %v234_v1 }
  0x70   :  { %v236_v17 = vmul.f32 %v235_v16, %v229_v62 }
  0x72   :  { %v238_v9 = vsel %vm237_vm2, %v229_v62, %v236_v17 }
  0x73   :  { %v241_v55 = vsel %vm239_vm3, %v240_v2, %v238_v9 }
  0x74   :  { %v242_v56 = vmul.f32 2.0, %v241_v55 }
  0x76   :  { %v243_v63 = vsub.f32 %v200_v4, %v242_v56 }
  0x78   :  { %v244_v44 = vadd.f32 %v243_v63, %v197_v26 }
  0x7a   :  { %v245_v3 = vmax.f32 %v244_v44, 1e-06 }
  0x7c   :  { %v246_v11 = vadd.f32 1.0, %v245_v3  ;;  %v249_v6 = vmul.f32 -0.5, %v245_v3  ;;  %v252_v5 = vand.u32 2147483647, %v245_v3 }
  0x7e   :  { %288 = vlog2.f32 %v246_v11  ;;  %v250_v20 = vadd.f32 1.0, %v249_v6  ;;  %vm253_vm4 = vcmp.lt.f32.partialorder %v252_v5, 0.0004427343 }
  0x80   :  { %v251_v22 = vmul.f32 %v250_v20, %v245_v3 }
  0x84   :  { %v289_v23 = vpop.eup %288 }
  0x85   :  { %v248_v31 = vmul.f32 0.6931472, %v289_v23 }
  0x87   :  { %v254_v24 = vsel %vm253_vm4, %v251_v22, %v248_v31 }
  0x88   :  { %v255_v25 = vadd.f32 1.0, %v254_v24 }
  0x8a   :  { %290 = vrcp.f32 %v255_v25 }
  0x90   :  { %v291_v26 = vpop.eup %290 }
  0x91   :  { %v257_v27 = vmul.f32 %v291_v26, %v254_v24 }
  0x93   :  { %258 = vst [vmem:[#allocation7] sm:$0x1] %v257_v27 }
  0x94   :  { %269 = dma.vmem_to_hbm [thread:$0]  %s265_s1, 16, %s267_s23, [#allocation4]  }
  0x95   :  { %368 = dma.done.wait [#allocation4], 16  }
  0x96   :  { %369 = vsyncadd [#allocation4], 4294967280 }
  0x97   :  { %274 = vsyncpa [#allocation3], 1 }
  0x98   :  { %275 = vsyncpa [#allocation6], 1 }
  0x99   :  { %276 = vsyncpa [#allocation4], 1 }

</bundles_post_ra>
